<compile_context>
chip_gen: v6e
topology: v6e:2x2x1
jax: 0.10.0
libtpu: 0.0.40
codegen_flags: <defaults>
</compile_context>

<pallas_src>
import jax
import jax.numpy as jnp
from jax.experimental import pallas as pl
from jax.experimental.pallas import tpu as pltpu

EMBEDDING_DIM = 8
HIDDEN_DIM = 16
NUM_USERS = 3
NUM_ITEMS = 3


def _ceil8(n):
    return ((n + 7) // 8) * 8


def _slab_layout(H, H2):
    """Row offsets of each resident operand inside the packed [rows, 128] slab.

    Every operand starts at lane 0 and at a sublane offset that is a multiple
    of 8, so each static slice stays within whole (8,128) tiles.
    """
    r_au = 0
    r_ai = r_au + _ceil8(H)
    r_b1 = r_ai + _ceil8(H)
    r_w2 = r_b1 + _ceil8(H)
    r_b2 = r_w2 + _ceil8(H2)
    r_w3 = r_b2 + _ceil8(H2)
    r_b3 = r_w3 + _ceil8(H2)
    rows = r_b3 + 8
    return dict(au=r_au, ai=r_ai, b1=r_b1, w2=r_w2, b2=r_b2, w3=r_w3,
                b3=r_b3, rows=rows)


def _make_kernel(H, H2, u_pad, i_pad, sub, n_sub):
    L = _slab_layout(H, H2)

    def kernel(uid_ref, iid_ref, slab_ref, out_ref):
        f32 = jnp.float32

        # Hoisted, static slices of the single packed weight slab (loaded once
        # per grid step, reused by every sub-tile of the unrolled loop below).
        au = slab_ref[L["au"]:L["au"] + H, 0:u_pad]      # fc1_user folded into user table
        ai = slab_ref[L["ai"]:L["ai"] + H, 0:i_pad]      # fc1_item folded into item table
        b1 = slab_ref[L["b1"]:L["b1"] + H, 0:1]          # [H, 1]
        w2 = slab_ref[L["w2"]:L["w2"] + H2, 0:H]         # [H2, H]
        b2 = slab_ref[L["b2"]:L["b2"] + H2, 0:1]         # [H2, 1]
        w3 = slab_ref[L["w3"]:L["w3"] + H2, 0:1]         # [H2, 1]
        b3 = slab_ref[L["b3"]:L["b3"] + 1, 0:1]          # [1, 1]

        iota_u = jax.lax.broadcasted_iota(jnp.int32, (u_pad, sub), 0)
        iota_i = jax.lax.broadcasted_iota(jnp.int32, (i_pad, sub), 0)

        def body(s, carry):
            j = pl.multiple_of(s * sub, sub)
            uid = uid_ref[:, pl.ds(j, sub)]              # [1, sub] int32 (batch on lanes)
            iid = iid_ref[:, pl.ds(j, sub)]

            # One-hot gather on the MXU; fc1 already folded into au/ai, so this
            # single pair of matmuls is (embedding lookup + fc1) at once.
            # Out-of-range ids produce an all-zero column; padded batch lanes
            # carry id 0 and are sliced off in the wrapper.
            oh_u = (iota_u == uid).astype(f32)           # [u_pad, sub]
            oh_i = (iota_i == iid).astype(f32)           # [i_pad, sub]

            h1 = (jnp.dot(au, oh_u, preferred_element_type=f32)
                  + jnp.dot(ai, oh_i, preferred_element_type=f32)
                  + b1)                                  # [H, sub]
            h1 = jnp.maximum(h1, 0.0)

            h2 = jnp.dot(w2, h1, preferred_element_type=f32) + b2   # [H2, sub]
            h2 = jnp.maximum(h2, 0.0)

            # fc3 (out_features == 1): VPU multiply + sublane reduce, lane-dense store.
            out_ref[:, pl.ds(j, sub)] = (
                jnp.sum(h2 * w3, axis=0, keepdims=True) + b3)
            return carry

        jax.lax.fori_loop(0, n_sub, body, 0, unroll=True)

    return kernel


def cf_forward(user_id, item_id, params, *, tb=1024, sub=128):
    """Forward pass. user_id/item_id: int32 [B]. Returns float32 [B] (squeezed)."""
    user_tbl, item_tbl, w1, b1, w2, b2, w3, b3 = params   # torch-layout weights
    E = user_tbl.shape[1]
    H = w1.shape[0]
    H2 = w2.shape[0]
    num_users = user_tbl.shape[0]
    num_items = item_tbl.shape[0]
    B = user_id.shape[0]

    # --- tile geometry: big batch tile, unrolled 128-lane sub-tiles inside -----
    b_sub = pl.cdiv(B, sub) * sub              # batch rounded to the sub-tile
    tb = max(sub, min(tb, b_sub))              # don't over-pad tiny batches
    tb = (tb // sub) * sub                     # grid tile = whole number of sub-tiles
    n_sub = tb // sub
    nb = pl.cdiv(B, tb)
    b_pad = nb * tb
    # On v7x keep nb >= 2 for real batches so the "parallel" axis load-balances
    # across both TensorCores; for the tiny demo batch nb == 1 is unavoidable.

    # --- ids: batch on the lane axis; pad only when the batch is ragged --------
    uid = user_id.astype(jnp.int32)
    iid = item_id.astype(jnp.int32)
    if b_pad != B:
        uid = jnp.pad(uid, (0, b_pad - B))
        iid = jnp.pad(iid, (0, b_pad - B))
    uid = uid.reshape(1, b_pad)
    iid = iid.reshape(1, b_pad)

    # --- fold fc1 into the tables and pack all residents into one f32 slab -----
    # h1 = W1u @ ue + W1i @ ie + b1 = (W1u @ U.T) @ onehot_u + (W1i @ I.T) @ onehot_i + b1
    au = (w1[:, :E].astype(jnp.float32) @ user_tbl.T.astype(jnp.float32))  # [H, num_users]
    ai = (w1[:, E:].astype(jnp.float32) @ item_tbl.T.astype(jnp.float32))  # [H, num_items]
    u_pad = _ceil8(max(num_users, 8))
    i_pad = _ceil8(max(num_items, 8))
    assert u_pad <= 128 and i_pad <= 128 and H <= 128 and H2 <= 128, \
        "slab layout assumes each operand fits in one 128-lane row block"
    # TODO(synk): for large embedding tables (thousands of rows) replace the
    # folded one-hot gather by a scalar-prefetched DMA gather to stay inside
    # v7x's 64 MiB VMEM and keep MXU work O(B) instead of O(num_rows * B).

    L = _slab_layout(H, H2)
    slab = jnp.zeros((L["rows"], 128), jnp.float32)
    slab = slab.at[L["au"]:L["au"] + H, 0:num_users].set(au)
    slab = slab.at[L["ai"]:L["ai"] + H, 0:num_items].set(ai)
    slab = slab.at[L["b1"]:L["b1"] + H, 0].set(b1.astype(jnp.float32))
    slab = slab.at[L["w2"]:L["w2"] + H2, 0:H].set(w2.astype(jnp.float32))
    slab = slab.at[L["b2"]:L["b2"] + H2, 0].set(b2.astype(jnp.float32))
    slab = slab.at[L["w3"]:L["w3"] + H2, 0].set(w3.reshape(H2).astype(jnp.float32))
    slab = slab.at[L["b3"], 0].set(b3.reshape(())[()].astype(jnp.float32))

    id_spec = pl.BlockSpec((1, tb), lambda j: (0, j))
    slab_spec = pl.BlockSpec(slab.shape, lambda j: (0, 0))   # resident across the grid
    out_spec = pl.BlockSpec((1, tb), lambda j: (0, j))

    kernel = _make_kernel(H, H2, u_pad, i_pad, sub, n_sub)

    out = pl.pallas_call(
        kernel,
        out_shape=jax.ShapeDtypeStruct((1, b_pad), jnp.float32),
        grid_spec=pltpu.PrefetchScalarGridSpec(
            num_scalar_prefetch=0,
            grid=(nb,),
            in_specs=[id_spec, id_spec, slab_spec],
            out_specs=out_spec,
        ),
        compiler_params=pltpu.CompilerParams(
            dimension_semantics=("parallel",)),
    )(uid, iid, slab)

    # Match torch's x.squeeze() for B > 1: [1, B_pad] -> [B].
    return out[0, :B]


def init_params(key):
    """Deterministic parameter init, torch layouts ([out, in] Linear weights)."""
    E, H = EMBEDDING_DIM, HIDDEN_DIM
    ks = jax.random.split(key, 8)

    user_tbl = jax.random.normal(ks[0], (NUM_USERS, E), jnp.float32)
    item_tbl = jax.random.normal(ks[1], (NUM_ITEMS, E), jnp.float32)

    def linear(kw, kb, fan_in, fan_out):
        bound = 1.0 / jnp.sqrt(fan_in)
        w = jax.random.uniform(kw, (fan_out, fan_in), jnp.float32, -bound, bound)
        b = jax.random.uniform(kb, (fan_out,), jnp.float32, -bound, bound)
        return w, b

    w1, b1 = linear(ks[2], ks[3], 2 * E, H)
    w2, b2 = linear(ks[4], ks[5], H, H // 2)
    w3, b3 = linear(ks[6], ks[7], H // 2, 1)

    return (user_tbl, item_tbl, w1, b1, w2, b2, w3, b3)


def cf_forward_ref(user_id, item_id, params):
    """Pure-JAX reference for validation."""
    user_tbl, item_tbl, w1, b1, w2, b2, w3, b3 = params
    x = jnp.concatenate(
        [jnp.take(user_tbl, user_id, axis=0), jnp.take(item_tbl, item_id, axis=0)],
        axis=1)
    x = jnp.maximum(x @ w1.T + b1, 0.0)
    x = jnp.maximum(x @ w2.T + b2, 0.0)
    x = x @ w3.T + b3
    return x[:, 0]


if __name__ == "__main__":
    key = jax.random.PRNGKey(0)
    params = init_params(key)

    # The interaction data from the reference module (6 user/item pairs).
    user_id = jnp.array([0, 0, 1, 1, 2, 2], dtype=jnp.int32)
    item_id = jnp.array([0, 1, 0, 2, 1, 2], dtype=jnp.int32)

    out = cf_forward(user_id, item_id, params)
    out = jax.block_until_ready(out)

    ref = cf_forward_ref(user_id, item_id, params)
    assert out.shape == (user_id.shape[0],)
    assert jnp.allclose(out, ref, atol=1e-4, rtol=1e-4), (out, ref)

    # Larger (still small) batch exercising multi-grid-step, the unrolled
    # 128-lane sub-tile loop, and the ragged-tail padding path.
    kb = jax.random.split(key, 3)
    big_u = jax.random.randint(kb[1], (3000,), 0, NUM_USERS, dtype=jnp.int32)
    big_i = jax.random.randint(kb[2], (3000,), 0, NUM_ITEMS, dtype=jnp.int32)
    out_big = jax.block_until_ready(cf_forward(big_u, big_i, params))
    ref_big = cf_forward_ref(big_u, big_i, params)
    assert out_big.shape == (3000,)
    assert jnp.allclose(out_big, ref_big, atol=1e-4, rtol=1e-4)

    print("KERNEL_OK")
</pallas_src>

<mosaic_0001>
module attributes {stable_mosaic.version = 11 : i64} {
  func.func @kernel(%arg0: i32, %arg1: memref<1x128xi32, #tpu.memory_space<vmem>>, %arg2: memref<1x128xi32, #tpu.memory_space<vmem>>, %arg3: memref<80x128xf32, #tpu.memory_space<vmem>>, %arg4: memref<1x128xf32, #tpu.memory_space<vmem>>) attributes {dimension_semantics = [#tpu.dimension_semantics<parallel>], iteration_bounds = array<i64: 1>, scalar_prefetch = 0 : i64, scratch_operands = 0 : i64, tpu.core_type = #tpu.core_type<tc>, window_params = [{transform_indices = @transform_0, window_bounds = array<i64: 1, 128>}, {transform_indices = @transform_1, window_bounds = array<i64: 1, 128>}, {pipeline_mode = #tpu.pipeline_mode<synchronous>, transform_indices = @transform_2, window_bounds = array<i64: 80, 128>}, {transform_indices = @transform_3, window_bounds = array<i64: 1, 128>}]} {
    %c0 = arith.constant 0 : index
    %c0_0 = arith.constant 0 : index
    %0 = vector.load %arg3[%c0, %c0_0] : memref<80x128xf32, #tpu.memory_space<vmem>>, vector<16x8xf32>
    %c16 = arith.constant 16 : index
    %c0_1 = arith.constant 0 : index
    %1 = vector.load %arg3[%c16, %c0_1] : memref<80x128xf32, #tpu.memory_space<vmem>>, vector<16x8xf32>
    %c32 = arith.constant 32 : index
    %c0_2 = arith.constant 0 : index
    %2 = vector.load %arg3[%c32, %c0_2] : memref<80x128xf32, #tpu.memory_space<vmem>>, vector<16x1xf32>
    %c48 = arith.constant 48 : index
    %c0_3 = arith.constant 0 : index
    %3 = vector.load %arg3[%c48, %c0_3] : memref<80x128xf32, #tpu.memory_space<vmem>>, vector<8x16xf32>
    %c56 = arith.constant 56 : index
    %c0_4 = arith.constant 0 : index
    %4 = vector.load %arg3[%c56, %c0_4] : memref<80x128xf32, #tpu.memory_space<vmem>>, vector<8x1xf32>
    %c64 = arith.constant 64 : index
    %c0_5 = arith.constant 0 : index
    %5 = vector.load %arg3[%c64, %c0_5] : memref<80x128xf32, #tpu.memory_space<vmem>>, vector<8x1xf32>
    %c72 = arith.constant 72 : index
    %c0_6 = arith.constant 0 : index
    %6 = vector.load %arg3[%c72, %c0_6] : memref<80x128xf32, #tpu.memory_space<vmem>>, vector<1x1xf32>
    %7 = tpu.iota {dimensions = array<i32: 0>} : vector<8x128xi32>
    %8 = tpu.iota {dimensions = array<i32: 0>} : vector<8x128xi32>
    %c0_i32 = arith.constant 0 : i32
    %c128_i32 = arith.constant 128 : i32
    %9 = arith.muli %c0_i32, %c128_i32 : i32
    %10 = tpu.assume_multiple %9, 128 : i32
    %c0_7 = arith.constant 0 : index
    %11 = arith.index_cast %10 : i32 to index
    %12 = vector.load %arg1[%c0_7, %11] : memref<1x128xi32, #tpu.memory_space<vmem>>, vector<1x128xi32>
    %c0_8 = arith.constant 0 : index
    %13 = arith.index_cast %10 : i32 to index
    %14 = vector.load %arg2[%c0_8, %13] : memref<1x128xi32, #tpu.memory_space<vmem>>, vector<1x128xi32>
    %15 = vector.broadcast %12 : vector<1x128xi32> to vector<8x128xi32>
    %16 = arith.cmpi eq, %7, %15 : vector<8x128xi32>
    %17 = arith.extui %16 : vector<8x128xi1> to vector<8x128xi32>
    %18 = arith.sitofp %17 : vector<8x128xi32> to vector<8x128xf32>
    %19 = vector.broadcast %14 : vector<1x128xi32> to vector<8x128xi32>
    %20 = arith.cmpi eq, %8, %19 : vector<8x128xi32>
    %21 = arith.extui %20 : vector<8x128xi1> to vector<8x128xi32>
    %22 = arith.sitofp %21 : vector<8x128xi32> to vector<8x128xf32>
    %cst = arith.constant dense<0.000000e+00> : vector<16x128xf32>
    %23 = tpu.matmul %0, %18, %cst {dimension_numbers = #tpu.dot_dimension_numbers<[1], [0], [0], [1], [0, 0, 1, 1], [], []>} : vector<16x8xf32>, vector<8x128xf32>, vector<16x128xf32> -> vector<16x128xf32>
    %cst_9 = arith.constant dense<0.000000e+00> : vector<16x128xf32>
    %24 = tpu.matmul %1, %22, %cst_9 {dimension_numbers = #tpu.dot_dimension_numbers<[1], [0], [0], [1], [0, 0, 1, 1], [], []>} : vector<16x8xf32>, vector<8x128xf32>, vector<16x128xf32> -> vector<16x128xf32>
    %25 = arith.addf %23, %24 : vector<16x128xf32>
    %26 = vector.broadcast %2 : vector<16x1xf32> to vector<16x128xf32>
    %27 = arith.addf %25, %26 : vector<16x128xf32>
    %cst_10 = arith.constant 0.000000e+00 : f32
    %28 = vector.broadcast %cst_10 : f32 to vector<16x128xf32>
    %29 = arith.maximumf %27, %28 : vector<16x128xf32>
    %cst_11 = arith.constant dense<0.000000e+00> : vector<8x128xf32>
    %30 = tpu.matmul %3, %29, %cst_11 {dimension_numbers = #tpu.dot_dimension_numbers<[1], [0], [0], [1], [0, 0, 1, 1], [], []>} : vector<8x16xf32>, vector<16x128xf32>, vector<8x128xf32> -> vector<8x128xf32>
    %31 = vector.broadcast %4 : vector<8x1xf32> to vector<8x128xf32>
    %32 = arith.addf %30, %31 : vector<8x128xf32>
    %cst_12 = arith.constant 0.000000e+00 : f32
    %33 = vector.broadcast %cst_12 : f32 to vector<8x128xf32>
    %34 = arith.maximumf %32, %33 : vector<8x128xf32>
    %35 = vector.broadcast %5 : vector<8x1xf32> to vector<8x128xf32>
    %36 = arith.mulf %34, %35 : vector<8x128xf32>
    %cst_13 = arith.constant dense<0.000000e+00> : vector<128xf32>
    %37 = vector.multi_reduction <add>, %36, %cst_13 [0] : vector<8x128xf32> to vector<128xf32>
    %38 = vector.shape_cast %37 : vector<128xf32> to vector<1x128xf32>
    %39 = vector.broadcast %6 : vector<1x1xf32> to vector<1x128xf32>
    %40 = arith.addf %38, %39 : vector<1x128xf32>
    %c0_14 = arith.constant 0 : index
    %41 = arith.index_cast %10 : i32 to index
    %42 = vector.load %arg4[%c0_14, %41] : memref<1x128xf32, #tpu.memory_space<vmem>>, vector<1x128xf32>
    tpu.vector_store %arg4[%c0_14, %41], %40 {strides = array<i32>} : memref<1x128xf32, #tpu.memory_space<vmem>>, vector<1x128xf32>,
    %c1_i32 = arith.constant 1 : i32
    return
  }
  func.func @transform_0(%arg0: i32) -> (i32, i32) {
    %c0_i32 = arith.constant 0 : i32
    %c0_i32_0 = arith.constant 0 : i32
    return %c0_i32, %arg0 : i32, i32
  }
  func.func @transform_1(%arg0: i32) -> (i32, i32) {
    %c0_i32 = arith.constant 0 : i32
    %c0_i32_0 = arith.constant 0 : i32
    return %c0_i32, %arg0 : i32, i32
  }
  func.func @transform_2(%arg0: i32) -> (i32, i32) {
    %c0_i32 = arith.constant 0 : i32
    %c0_i32_0 = arith.constant 0 : i32
    %c0_i32_1 = arith.constant 0 : i32
    return %c0_i32, %c0_i32_0 : i32, i32
  }
  func.func @transform_3(%arg0: i32) -> (i32, i32) {
    %c0_i32 = arith.constant 0 : i32
    %c0_i32_0 = arith.constant 0 : i32
    return %c0_i32, %arg0 : i32, i32
  }
}

</mosaic_0001>

<bundles_post_ra>
// kernel: tpu_custom_call.1
= control target key start
LH: loop header
LB: loop body
LE: loop exit
PB: predicated region body
PF: predicated region fallthrough
CT: control target
= control target key end

     0   :  { %8 = vsyncpa [#allocation3], 0  ;;  %s520_s0 = inlined_call_operand.hbm [shape: s32[1,128], index: 0, kind: input, shape index: {}]   ;;  %s521_s1 = inlined_call_operand.vmem [shape: s32[1,128], index: 1, kind: input, shape index: {}]   ;;  %s522_s2 = inlined_call_operand.hbm [shape: f32[80,128], index: 2, kind: input, shape index: {}]   ;;  %s523_s3 = inlined_call_operand.hbm [shape: f32[1,128], index: 3, kind: output, shape index: {}]  }
   0x1   :  { %9 = vsyncpa [#allocation6], 0 }
   0x2   :  { %10 = vsyncpa [#allocation4], 0  ;;  %s475_s12 = smov [#allocation2]   ;;  %s476_s14 = smov [#allocation5]  }
   0x3   :  { %s17_s13 = sshll.u32 %s475_s12, 4  ;;  %s28_s15 = sshll.u32 %s476_s14, 4  ;;  %s18_s13 = int_to_ptr.vmem [resolvable:$true] %s17_s13  ;;  %s29_s15 = int_to_ptr.vmem [resolvable:$true] %s28_s15 }
   0x4   :  { %s417_s16 = scalar_lea.vmem %s18_s13, 16  ;;  %s421_s17 = scalar_lea.vmem %s18_s13, 32 }
   0x5   :  { %p418_p0 = scmp.ne.s32.totalorder %s18_s13, %s417_s16  ;;  %p422_p1 = scmp.lt.s32.totalorder %s18_s13, %s18_s13 }
   0x6   :  { %p423_p2 = scmp.lt.s32.totalorder %s421_s17, %s417_s16 }
   0x8   :  { %p424_p3 = por %p423_p2, %p422_p1 }
   0xa   :  { %p425_p4 = pnand %p424_p3, %p418_p0 }
   0xc   :  { %428 = shalt.err (!%p425_p4)
}
   0xd   :  { %20 = dma.hbm_to_vmem [thread:$0]  %s520_s0, 16, %s18_s13, [#allocation3]  }
   0xe   :  { %s437_s20 = scalar_lea.vmem %s29_s15, 1280  ;;  %p442_p6 = scmp.lt.s32.totalorder %s29_s15, %s29_s15 }
   0xf   :  { %p438_p5 = scmp.ne.s32.totalorder %s29_s15, %s437_s20  ;;  %p443_p7 = scmp.lt.s32.totalorder %s437_s20, %s437_s20 }
  0x11   :  { %p444_p8 = por %p443_p7, %p442_p6 }
  0x13   :  { %p445_p9 = pnand %p444_p8, %p438_p5 }
  0x15   :  { %448 = shalt.err (!%p445_p9)
}
  0x16   :  { %s477_s21 = smov 128   ;;  %s478_s22 = smov 8  }
  0x17   :  { %34 = dma.hbm_to_vmem [thread:$0]  %s522_s2, 1280, %s29_s15, [#allocation6], %s477_s21, %s477_s21, %s478_s22  }
  0x18   :  { %469 = dma.done.wait [#allocation3], 16  }
  0x19   :  { %470 = vsyncadd [#allocation3], 4294967280 }
  0x1a   :  { %471 = dma.done.wait [#allocation6], 1280  }
  0x1b   :  { %472 = vsyncadd [#allocation6], 4294966016  ;;  %v51_v0 = vlaneseq  ;;  %v479_v1 = vmov 0   ;;  %vm69_vm0 = vcmask 64512   ;;  %v363_v3 = vld [vmem:[%s521_s1] ss:$0 sm:$0xff] }
  0x1c   :  { %407 = vset.pattern.permute.xlu0 %v479_v1  ;;  %408 = vset.pattern.permute.xlu1 %v479_v1  ;;  %v361_v4 = vld [vmem:[#allocation2] ss:$0 sm:$0xff]  ;;  %v43_v5 = vld [vmem:[#allocation5 + $0x10] sm:$0xff]  ;;  %v41_v6 = vld [vmem:[#allocation5] sm:$0xff]  ;;  %v480_v8 = vmov 1.0   ;;  %v481_v13 = vmov 0.0  }
  0x1d   :  { %v52_v2 = vshrl.u32 %v51_v0, 7  ;;  %383 = vmatprep.mubr.msk.f32.mxu0 %vm69_vm0, %v43_v5  ;;  %v44_v7 = vld [vmem:[#allocation5 + $0x18] sm:$0xff]  ;;  %v42_v9 = vld [vmem:[#allocation5 + $0x8] sm:$0xff]  ;;  %388 = vmatprep.mubr.msk.f32.mxu1 %vm69_vm0, %v41_v6  ;;  %v45_v11 = vld [vmem:[#allocation5 + $0x20] sm:$0xff]  ;;  %vm482_vm3 = vmmov 0   ;;  %vm251_vm4 = vcmask 130048  }
  0x1e   :  { %v46_v10 = vld [vmem:[#allocation5 + $0x28] sm:$0xff]  ;;  %v48_v14 = vld [vmem:[#allocation5 + $0x38] sm:$0xff]  ;;  %v49_v15 = vld [vmem:[#allocation5 + $0x40] sm:$0xff]  ;;  %s483_s1 = smov [#allocation7]  }
  0x1f   :  { %vm66_vm1 = vcmp.eq.s32.totalorder %v52_v2, %v363_v3  ;;  %vm59_vm2 = vcmp.eq.s32.totalorder %v52_v2, %v361_v4  ;;  %239 = vperm.xlu0 %407, %v46_v10   ;;  %v50_v12 = vld [vmem:[#allocation5 + $0x48] sm:$0x1]  ;;  %248 = vperm.xlu1 %408, %v48_v14   ;;  %v47_v28 = vld [vmem:[#allocation5 + $0x30] sm:$0xff]  ;;  %s351_s2 = sshll.u32 %s483_s1, 4  ;;  %s352_s2 = int_to_ptr.vmem [resolvable:$true] %s351_s2 }
  0x20   :  { %381 = vmatprep.subr.msk.mxu0 %vm66_vm1, %v480_v8  ;;  %386 = vmatprep.subr.msk.mxu1 %vm59_vm2, %v480_v8  ;;  %s449_s26 = scalar_lea.vmem %s352_s2, 16  ;;  %s453_s27 = scalar_lea.vmem %s352_s2, 32 }
  0x21   :  { %382 = vmatpush3.msk.msra.mxu0 %vm66_vm1, %v480_v8  ;;  %387 = vmatpush3.msk.msra.mxu1 %vm59_vm2, %v480_v8  ;;  %p450_p10 = scmp.ne.s32.totalorder %s352_s2, %s449_s26  ;;  %p454_p11 = scmp.lt.s32.totalorder %s352_s2, %s352_s2 }
  0x22   :  { %384 = vmatmul.mubr.msk.f32.vlgmr.msra.gmra.mxu0 %vm69_vm0, %v44_v7  ;;  %389 = vmatmul.mubr.msk.f32.vlgmr.msra.gmra.mxu1 %vm69_vm0, %v42_v9  ;;  %p455_p12 = scmp.lt.s32.totalorder %s453_s27, %s449_s26 }
  0x23   :  { %234 = vperm.xlu0 %407, %v45_v11   ;;  %391 = vmatprep.subr.mxu0 %v481_v13 }
  0x24   :  { %395 = vmatprep.mubr.msk.f32.mxu0 %vm482_vm3, %v481_v13  ;;  %328 = vperm.xlu1 %408, %v49_v15   ;;  %p456_p13 = por %p455_p12, %p454_p11 }
  0x26   :  { %p457_p0 = pnand %p456_p13, %p450_p10 }
  0x27   :  { %340 = vperm.xlu0 %407, %v50_v12  }
  0x9a   :  { %v240_v16 = vpop.permute.xlu0 %239  ;;  %v249_v29 = vpop.permute.xlu1 %248 }
  0x9e   :  { %v235_v24 = vpop.permute.xlu0 %234 }
  0x9f   :  { %v329_v34 = vpop.permute.xlu1 %328 }
  0xa2   :  { %v341_v42 = vpop.permute.xlu0 %340 }
  0xe2   :  { %v385_v17 = vpop.f32.mrf.mxu0  ;;  %v390_v18 = vpop.f32.mrf.mxu1 }
  0xe3   :  { %v229_v19 = vadd.f32 %v390_v18, %v385_v17 }
  0xe4   :  { %v142_v20 = vpop.f32.mrf.mxu0  ;;  %v223_v21 = vpop.f32.mrf.mxu1 }
  0xe5   :  { %v243_v22 = vadd.f32 %v240_v16, %v229_v19  ;;  %v224_v23 = vadd.f32 %v223_v21, %v142_v20 }
  0xe7   :  { %v245_v25 = vmax.f32 %v243_v22, 0.0  ;;  %v242_v26 = vadd.f32 %v235_v24, %v224_v23 }
  0xe9   :  { %v244_v27 = vmax.f32 %v242_v26, 0.0  ;;  %392 = vmatpush3.msra.mxu0 %v245_v25 }
  0xea   :  { %393 = vmatprep.subr.mxu0 %v481_v13 }
  0xeb   :  { %394 = vmatpush3.msra.mxu0 %v244_v27 }
  0xec   :  { %396 = vmatmul.mubr.msk.f32.vlgmr.msra.gmra.mxu0 %vm251_vm4, %v47_v28 }
 0x1ac   :  { %v321_v30 = vpop.f32.mrf.mxu0 }
 0x1ad   :  { %v322_v31 = vadd.f32 %v321_v30, %v249_v29 }
 0x1ae   :  { %v397_v32 = vpop.f32.mrf.mxu0 }
 0x1af   :  { %v325_v33 = vmax.f32 %v322_v31, 0.0 }
 0x1b1   :  { %v331_v35 = vmul.f32 %v329_v34, %v325_v33 }
 0x1b3   :  { %v332_v36 = vrot.slane %v331_v35, 4 }
 0x1b5   :  { %v333_v37 = vadd.f32 %v332_v36, %v331_v35 }
 0x1b7   :  { %v334_v38 = vrot.slane %v333_v37, 2 }
 0x1b9   :  { %v335_v39 = vadd.f32 %v334_v38, %v333_v37 }
 0x1bb   :  { %v336_v40 = vrot.slane %v335_v39, 1 }
 0x1bd   :  { %v337_v41 = vadd.f32 %v336_v40, %v335_v39 }
 0x1bf   :  { %v343_v43 = vadd.f32 %v341_v42, %v337_v41 }
 0x1c1   :  { %344 = vst [vmem:[#allocation7] sm:$0x1] %v343_v43 }
 0x1c2   :  { %460 = shalt.err (!%p457_p0)
}
 0x1c3   :  { %354 = dma.vmem_to_hbm [thread:$0]  %s352_s2, 16, %s523_s3, [#allocation4]  }
 0x1c4   :  { %473 = dma.done.wait [#allocation4], 16  }
 0x1c5   :  { %474 = vsyncadd [#allocation4], 4294967280 }
 0x1c6   :  { %358 = vsyncpa [#allocation3], 1 }
 0x1c7   :  { %359 = vsyncpa [#allocation6], 1 }
 0x1c8   :  { %360 = vsyncpa [#allocation4], 1 }

</bundles_post_ra>
